<compile_context>
chip_gen: v7x
topology: tpu7x:2x2x1
jax: 0.10.0
libtpu: 0.0.40
codegen_flags: <defaults>
</compile_context>

<pallas_src>
import functools

import jax
import jax.numpy as jnp
from jax.experimental import pallas as pl
from jax.experimental.pallas import tpu as pltpu


# ----------------------------------------------------------------------------
# small helpers
# ----------------------------------------------------------------------------
def _round_up(n, m):
    return ((n + m - 1) // m) * m


def _largest_tile(dim, preferred, base):
    """Largest multiple of `base` that divides `dim` and is <= preferred.
    `dim` must be a multiple of `base`."""
    t = min(dim, (preferred // base) * base)
    t = max(t, base)
    while dim % t:
        t -= base
    return t


# ----------------------------------------------------------------------------
# Tiled dense kernel:  out = x @ w + b      (x bf16, w bf16, accum f32)
# Used for: GRU input projections (hoisted out of the recurrence), decoder
# context projection, and the output vocabulary projection.
# ----------------------------------------------------------------------------
def _dense_kernel(x_ref, w_ref, b_ref, o_ref):
    o_ref[...] = jnp.dot(x_ref[...], w_ref[...],
                         preferred_element_type=jnp.float32) + b_ref[...]


def dense_forward(x, w, b):
    """x: (N, K) float, w: (K, Vp) bf16, b: (1, Vp) f32 -> (N, Vp) f32.
    K and Vp are assumed 128-aligned (guaranteed by prepare_params)."""
    N, K = x.shape
    Vp = w.shape[1]
    Np = _round_up(N, 8)
    if Np != N:
        x = jnp.pad(x, ((0, Np - N), (0, 0)))
    x = x.astype(jnp.bfloat16)

    tm = _largest_tile(Np, 256, 8)
    tn = _largest_tile(Vp, 512, 128)

    out = pl.pallas_call(
        _dense_kernel,
        out_shape=jax.ShapeDtypeStruct((Np, Vp), jnp.float32),
        grid=(Np // tm, Vp // tn),
        in_specs=[pl.BlockSpec((tm, K), lambda i, j: (i, 0)),
                  pl.BlockSpec((K, tn), lambda i, j: (0, j)),
                  pl.BlockSpec((1, tn), lambda i, j: (0, j))],
        out_specs=pl.BlockSpec((tm, tn), lambda i, j: (i, j)),
        compiler_params=pltpu.CompilerParams(
            dimension_semantics=("parallel", "parallel")),
    )(x, w, b)
    return out[:N]


# ----------------------------------------------------------------------------
# GRU recurrence kernel.
# Inputs are already projected: xp[t] = x_t @ W_i_fused + b_i (+ ctx @ W_ctx
# for the decoder).  Per step only the (B,H) x (H,3H) hidden matmul remains on
# the serial path.  Grid is a 'parallel' batch-tile axis (megacore on v7x);
# the time loop runs inside the kernel (no per-step pipeline overhead) and the
# whole (T, bt, Hp) output slab is written back once, lane-dense.
# ----------------------------------------------------------------------------
def _gru_kernel(xp_ref, h0_ref, w_h_ref, b_h_ref, out_ref, h_scr):
    Hp = h0_ref.shape[-1]
    T = xp_ref.shape[0]

    h_scr[...] = h0_ref[...]
    w_h = w_h_ref[...]            # (Hp, 3Hp) bf16, resident
    b_h = b_h_ref[...]            # (1, 3Hp)  f32

    @pl.loop(0, T)
    def _(t):
        h = h_scr[...]                                            # (bt, Hp) f32
        gh = jnp.dot(h.astype(jnp.bfloat16), w_h,
                     preferred_element_type=jnp.float32) + b_h    # (bt, 3Hp)
        xp = xp_ref[t]                                            # (bt, 3Hp)
        # gate order [r | z | n]; slices are 128-lane aligned (Hp % 128 == 0)
        r = jax.nn.sigmoid(xp[:, :Hp] + gh[:, :Hp])
        z = jax.nn.sigmoid(xp[:, Hp:2 * Hp] + gh[:, Hp:2 * Hp])
        n = jnp.tanh(xp[:, 2 * Hp:] + r * gh[:, 2 * Hp:])
        h_new = (1.0 - z) * n + z * h
        h_scr[...] = h_new
        out_ref[t] = h_new


def gru_forward(xp, h0, w_h, b_h):
    """xp: (T, Bp, 3Hp) f32 pre-projected inputs, h0: (Bp, Hp) f32,
    w_h: (Hp, 3Hp) bf16, b_h: (1, 3Hp) f32  ->  (T, Bp, Hp) f32 hidden seq."""
    T, Bp, G = xp.shape
    Hp = h0.shape[-1]
    bt = _largest_tile(Bp, 128, 8)          # batch tile (parallel axis)

    return pl.pallas_call(
        _gru_kernel,
        out_shape=jax.ShapeDtypeStruct((T, Bp, Hp), jnp.float32),
        grid=(Bp // bt,),
        in_specs=[pl.BlockSpec((T, bt, G), lambda i: (0, i, 0)),
                  pl.BlockSpec((bt, Hp), lambda i: (i, 0)),
                  pl.BlockSpec((Hp, G), lambda i: (0, 0)),
                  pl.BlockSpec((1, G), lambda i: (0, 0))],
        out_specs=pl.BlockSpec((T, bt, Hp), lambda i: (0, i, 0)),
        scratch_shapes=[pltpu.VMEM((bt, Hp), jnp.float32)],
        compiler_params=pltpu.CompilerParams(
            dimension_semantics=("parallel",)),
    )(xp, h0, w_h, b_h)


# ----------------------------------------------------------------------------
# Parameters: raw per-gate (PyTorch-like) init, then a prep step that fuses
# gates, pads to (8,128)-aligned shapes, and casts weights to bf16.
# ----------------------------------------------------------------------------
def _init_gru_raw(key, in_size, hidden, scale=0.1):
    names = ["w_ir", "w_iz", "w_in", "w_hr", "w_hz", "w_hn",
             "b_ir", "b_iz", "b_in", "b_hr", "b_hz", "b_hn"]
    shapes = [(in_size, hidden)] * 3 + [(hidden, hidden)] * 3 + [(1, hidden)] * 6
    ks = jax.random.split(key, len(names))
    return {n: scale * jax.random.normal(k, s, jnp.float32)
            for n, k, s in zip(names, ks, shapes)}


def init_model_params(key, vocab_size, embed_size, num_hiddens):
    k_emb_e, k_emb_d, k_gru_e, k_gru_d, k_w, k_b = jax.random.split(key, 6)
    return {
        "enc_embedding": 0.1 * jax.random.normal(
            k_emb_e, (vocab_size, embed_size), jnp.float32),
        "dec_embedding": 0.1 * jax.random.normal(
            k_emb_d, (vocab_size, embed_size), jnp.float32),
        "enc_gru": _init_gru_raw(k_gru_e, embed_size, num_hiddens),
        # decoder GRU input is [embedded token ; context]  (size E + H)
        "dec_gru": _init_gru_raw(k_gru_d, embed_size + num_hiddens, num_hiddens),
        "dense_w": 0.1 * jax.random.normal(
            k_w, (num_hiddens, vocab_size), jnp.float32),
        "dense_b": 0.1 * jax.random.normal(k_b, (1, vocab_size), jnp.float32),
    }


def _fuse(mats, rows_pad, Hp, dtype):
    """Pad each (rows, H) gate matrix to (rows_pad, Hp) and concat -> (rows_pad, 3Hp)."""
    padded = [jnp.pad(m, ((0, rows_pad - m.shape[0]), (0, Hp - m.shape[1])))
              for m in mats]
    return jnp.concatenate(padded, axis=1).astype(dtype)


def prepare_params(raw, embed_size, num_hiddens, vocab_size):
    E, H, V = embed_size, num_hiddens, vocab_size
    Ep, Hp, Vp = _round_up(E, 128), _round_up(H, 128), _round_up(V, 128)
    enc, dec = raw["enc_gru"], raw["dec_gru"]

    # Split decoder input weights into token-part (rows :E) and context-part
    # (rows E:) so the context projection can be hoisted out of the time loop.
    dec_ix = {k: dec[k][:E] for k in ("w_ir", "w_iz", "w_in")}
    dec_ic = {k: dec[k][E:] for k in ("w_ir", "w_iz", "w_in")}

    bf16, f32 = jnp.bfloat16, jnp.float32
    return {
        "enc_emb": jnp.pad(raw["enc_embedding"], ((0, 0), (0, Ep - E))),
        "dec_emb": jnp.pad(raw["dec_embedding"], ((0, 0), (0, Ep - E))),

        "enc_w_i": _fuse([enc["w_ir"], enc["w_iz"], enc["w_in"]], Ep, Hp, bf16),
        "enc_b_i": _fuse([enc["b_ir"], enc["b_iz"], enc["b_in"]], 1, Hp, f32),
        "enc_w_h": _fuse([enc["w_hr"], enc["w_hz"], enc["w_hn"]], Hp, Hp, bf16),
        "enc_b_h": _fuse([enc["b_hr"], enc["b_hz"], enc["b_hn"]], 1, Hp, f32),

        "dec_w_ix": _fuse([dec_ix["w_ir"], dec_ix["w_iz"], dec_ix["w_in"]], Ep, Hp, bf16),
        "dec_w_ic": _fuse([dec_ic["w_ir"], dec_ic["w_iz"], dec_ic["w_in"]], Hp, Hp, bf16),
        "dec_b_i": _fuse([dec["b_ir"], dec["b_iz"], dec["b_in"]], 1, Hp, f32),
        "dec_w_h": _fuse([dec["w_hr"], dec["w_hz"], dec["w_hn"]], Hp, Hp, bf16),
        "dec_b_h": _fuse([dec["b_hr"], dec["b_hz"], dec["b_hn"]], 1, Hp, f32),

        "out_w": jnp.pad(raw["dense_w"], ((0, Hp - H), (0, Vp - V))).astype(bf16),
        "out_b": jnp.pad(raw["dense_b"], ((0, 0), (0, Vp - V))),
    }


# ----------------------------------------------------------------------------
# Forward pass.  `use_pallas=False` runs the identical math through plain JAX
# (lax.scan / jnp.dot) as a correctness reference.
# ----------------------------------------------------------------------------
def _proj(x, w, b, use_pallas):
    if use_pallas:
        return dense_forward(x, w, b)
    return jnp.dot(x.astype(jnp.bfloat16), w,
                   preferred_element_type=jnp.float32) + b


def _gru_seq(xp, h0, w_h, b_h, use_pallas):
    if use_pallas:
        return gru_forward(xp, h0, w_h, b_h)
    Hp = h0.shape[-1]

    def step(h, x):
        gh = jnp.dot(h.astype(jnp.bfloat16), w_h,
                     preferred_element_type=jnp.float32) + b_h
        r = jax.nn.sigmoid(x[:, :Hp] + gh[:, :Hp])
        z = jax.nn.sigmoid(x[:, Hp:2 * Hp] + gh[:, Hp:2 * Hp])
        n = jnp.tanh(x[:, 2 * Hp:] + r * gh[:, 2 * Hp:])
        h_new = (1.0 - z) * n + z * h
        return h_new, h_new

    _, out = jax.lax.scan(step, h0, xp)
    return out


@functools.partial(jax.jit, static_argnames=("dims", "use_pallas"))
def encoder_decoder_forward(params, enc_X, dec_X, *, dims, use_pallas=True):
    V, H = dims
    B, T = enc_X.shape
    Td = dec_X.shape[1]
    Hp = params["enc_w_h"].shape[0]
    Bp = _round_up(B, 8)

    def embed(table, ids):
        # TODO(synk): embedding gather / transpose / pad kept as plain-JAX glue.
        x = jnp.take(table, ids, axis=0)          # (B, T, Ep)
        x = jnp.transpose(x, (1, 0, 2))           # (T, B, Ep)
        return jnp.pad(x, ((0, 0), (0, Bp - B), (0, 0)))

    # ---------------- encoder ----------------
    xe = embed(params["enc_emb"], enc_X)                                   # (T, Bp, Ep)
    xpe = _proj(xe.reshape(T * Bp, -1),
                params["enc_w_i"], params["enc_b_i"], use_pallas)
    xpe = xpe.reshape(T, Bp, 3 * Hp)
    h0 = jnp.zeros((Bp, Hp), jnp.float32)
    enc_out = _gru_seq(xpe, h0, params["enc_w_h"], params["enc_b_h"], use_pallas)
    enc_hT = enc_out[-1]                                                   # (Bp, Hp)

    # ---------------- decoder (init_state = encoder final hidden) --------
    xd = embed(params["dec_emb"], dec_X)                                   # (Td, Bp, Ep)
    xpd = _proj(xd.reshape(Td * Bp, -1),
                params["dec_w_ix"], params["dec_b_i"], use_pallas)
    xpd = xpd.reshape(Td, Bp, 3 * Hp)
    # context projection computed ONCE (constant over time), added as bias
    ctx = _proj(enc_hT, params["dec_w_ic"],
                jnp.zeros((1, 3 * Hp), jnp.float32), use_pallas)           # (Bp, 3Hp)
    xpd = xpd + ctx[None]
    dec_out = _gru_seq(xpd, enc_hT, params["dec_w_h"], params["dec_b_h"], use_pallas)
    dec_hT = dec_out[-1]

    # output vocabulary projection (tiled GEMM)
    logits = _proj(dec_out.reshape(Td * Bp, Hp),
                   params["out_w"], params["out_b"], use_pallas)
    logits = logits.reshape(Td, Bp, -1)[:, :B, :V].transpose(1, 0, 2)      # (B, Td, V)
    state = dec_hT[:B, :H][None]                                           # (1, B, H)
    return logits, state


# ----------------------------------------------------------------------------
if __name__ == "__main__":
    vocab_size = 32
    embed_size = 16
    num_hiddens = 32
    batch = 2
    seq = 8

    key = jax.random.PRNGKey(0)
    k_params, k_enc, k_dec = jax.random.split(key, 3)
    raw = init_model_params(k_params, vocab_size, embed_size, num_hiddens)
    params = prepare_params(raw, embed_size, num_hiddens, vocab_size)

    enc_X = jax.random.randint(k_enc, (batch, seq), 0, vocab_size, dtype=jnp.int32)
    dec_X = jax.random.randint(k_dec, (batch, seq), 0, vocab_size, dtype=jnp.int32)

    dims = (vocab_size, num_hiddens)
    logits, dec_state = encoder_decoder_forward(
        params, enc_X, dec_X, dims=dims, use_pallas=True)
    jax.block_until_ready((logits, dec_state))

    ref_logits, ref_state = encoder_decoder_forward(
        params, enc_X, dec_X, dims=dims, use_pallas=False)

    assert logits.shape == (batch, seq, vocab_size)
    assert dec_state.shape == (1, batch, num_hiddens)
    assert jnp.allclose(logits, ref_logits, atol=1e-2, rtol=1e-2), "logits mismatch"
    assert jnp.allclose(dec_state, ref_state, atol=1e-2, rtol=1e-2), "state mismatch"

    print("KERNEL_OK")
</pallas_src>

<mosaic_0001>
module attributes {stable_mosaic.version = 11 : i64} {
  func.func @_dense_kernel(%arg0: i32, %arg1: i32, %arg2: memref<64x128xbf16, #tpu.memory_space<vmem>>, %arg3: memref<128x384xbf16, #tpu.memory_space<vmem>>, %arg4: memref<1x384xf32, #tpu.memory_space<vmem>>, %arg5: memref<64x384xf32, #tpu.memory_space<vmem>>) attributes {dimension_semantics = [#tpu.dimension_semantics<parallel>, #tpu.dimension_semantics<parallel>], iteration_bounds = array<i64: 1, 1>, scalar_prefetch = 0 : i64, scratch_operands = 0 : i64, tpu.core_type = #tpu.core_type<tc>, window_params = [{transform_indices = @transform_0, window_bounds = array<i64: 64, 128>}, {transform_indices = @transform_1, window_bounds = array<i64: 128, 384>}, {transform_indices = @transform_2, window_bounds = array<i64: 1, 384>}, {transform_indices = @transform_3, window_bounds = array<i64: 64, 384>}]} {
    %c0 = arith.constant 0 : index
    %c0_0 = arith.constant 0 : index
    %0 = vector.load %arg2[%c0, %c0_0] : memref<64x128xbf16, #tpu.memory_space<vmem>>, vector<64x128xbf16>
    %c0_1 = arith.constant 0 : index
    %c0_2 = arith.constant 0 : index
    %1 = vector.load %arg3[%c0_1, %c0_2] : memref<128x384xbf16, #tpu.memory_space<vmem>>, vector<128x384xbf16>
    %cst = arith.constant dense<0.000000e+00> : vector<64x384xf32>
    %2 = tpu.matmul %0, %1, %cst {dimension_numbers = #tpu.dot_dimension_numbers<[1], [0], [0], [1], [0, 0, 1, 1], [], []>} : vector<64x128xbf16>, vector<128x384xbf16>, vector<64x384xf32> -> vector<64x384xf32>
    %c0_3 = arith.constant 0 : index
    %c0_4 = arith.constant 0 : index
    %3 = vector.load %arg4[%c0_3, %c0_4] : memref<1x384xf32, #tpu.memory_space<vmem>>, vector<1x384xf32>
    %4 = vector.broadcast %3 : vector<1x384xf32> to vector<64x384xf32>
    %5 = arith.addf %2, %4 : vector<64x384xf32>
    %c0_5 = arith.constant 0 : index
    %c0_6 = arith.constant 0 : index
    %6 = vector.load %arg5[%c0_5, %c0_6] : memref<64x384xf32, #tpu.memory_space<vmem>>, vector<64x384xf32>
    tpu.vector_store %arg5[%c0_5, %c0_6], %5 {strides = array<i32>} : memref<64x384xf32, #tpu.memory_space<vmem>>, vector<64x384xf32>,
    return
  }
  func.func @transform_0(%arg0: i32, %arg1: i32) -> (i32, i32) {
    %c0_i32 = arith.constant 0 : i32
    %c0_i32_0 = arith.constant 0 : i32
    return %arg0, %c0_i32 : i32, i32
  }
  func.func @transform_1(%arg0: i32, %arg1: i32) -> (i32, i32) {
    %c0_i32 = arith.constant 0 : i32
    %c0_i32_0 = arith.constant 0 : i32
    return %c0_i32, %arg1 : i32, i32
  }
  func.func @transform_2(%arg0: i32, %arg1: i32) -> (i32, i32) {
    %c0_i32 = arith.constant 0 : i32
    %c0_i32_0 = arith.constant 0 : i32
    return %c0_i32, %arg1 : i32, i32
  }
  func.func @transform_3(%arg0: i32, %arg1: i32) -> (i32, i32) {
    %c0_i32 = arith.constant 0 : i32
    return %arg0, %arg1 : i32, i32
  }
}

module attributes {stable_mosaic.version = 11 : i64} {
  func.func @_gru_kernel(%arg0: i32, %arg1: memref<8x8x384xf32, #tpu.memory_space<vmem>>, %arg2: memref<8x128xf32, #tpu.memory_space<vmem>>, %arg3: memref<128x384xbf16, #tpu.memory_space<vmem>>, %arg4: memref<1x384xf32, #tpu.memory_space<vmem>>, %arg5: memref<8x8x128xf32, #tpu.memory_space<vmem>>, %arg6: memref<8x128xf32, #tpu.memory_space<vmem>>) attributes {dimension_semantics = [#tpu.dimension_semantics<parallel>], iteration_bounds = array<i64: 1>, scalar_prefetch = 0 : i64, scratch_operands = 1 : i64, tpu.core_type = #tpu.core_type<tc>, window_params = [{transform_indices = @transform_0, window_bounds = array<i64: 8, 8, 384>}, {transform_indices = @transform_1, window_bounds = array<i64: 8, 128>}, {pipeline_mode = #tpu.pipeline_mode<synchronous>, transform_indices = @transform_2, window_bounds = array<i64: 128, 384>}, {pipeline_mode = #tpu.pipeline_mode<synchronous>, transform_indices = @transform_3, window_bounds = array<i64: 1, 384>}, {transform_indices = @transform_4, window_bounds = array<i64: 8, 8, 128>}]} {
    %c0 = arith.constant 0 : index
    %c0_0 = arith.constant 0 : index
    %0 = vector.load %arg2[%c0, %c0_0] : memref<8x128xf32, #tpu.memory_space<vmem>>, vector<8x128xf32>
    %c0_1 = arith.constant 0 : index
    %c0_2 = arith.constant 0 : index
    %1 = vector.load %arg6[%c0_1, %c0_2] : memref<8x128xf32, #tpu.memory_space<vmem>>, vector<8x128xf32>
    tpu.vector_store %arg6[%c0_1, %c0_2], %0 {strides = array<i32>} : memref<8x128xf32, #tpu.memory_space<vmem>>, vector<8x128xf32>,
    %c0_3 = arith.constant 0 : index
    %c0_4 = arith.constant 0 : index
    %2 = vector.load %arg3[%c0_3, %c0_4] : memref<128x384xbf16, #tpu.memory_space<vmem>>, vector<128x384xbf16>
    %c0_5 = arith.constant 0 : index
    %c0_6 = arith.constant 0 : index
    %3 = vector.load %arg4[%c0_5, %c0_6] : memref<1x384xf32, #tpu.memory_space<vmem>>, vector<1x384xf32>
    %c0_i32 = arith.constant 0 : i32
    %c8_i32 = arith.constant 8 : i32
    %4 = arith.addi %c0_i32, %c8_i32 : i32
    %c1_i32 = arith.constant 1 : i32
    scf.for %arg7 = %c0_i32 to %4 step %c1_i32  : i32 {
      %c1_i32_8 = arith.constant 1 : i32
      %5 = arith.muli %arg7, %c1_i32_8 : i32
      %c0_i32_9 = arith.constant 0 : i32
      %6 = arith.addi %c0_i32_9, %5 : i32
      %c0_10 = arith.constant 0 : index
      %c0_11 = arith.constant 0 : index
      %7 = vector.load %arg6[%c0_10, %c0_11] : memref<8x128xf32, #tpu.memory_space<vmem>>, vector<8x128xf32>
      %8 = arith.truncf %7 : vector<8x128xf32> to vector<8x128xbf16>
      %cst = arith.constant dense<0.000000e+00> : vector<8x384xf32>
      %9 = tpu.matmul %8, %2, %cst {dimension_numbers = #tpu.dot_dimension_numbers<[1], [0], [0], [1], [0, 0, 1, 1], [], []>} : vector<8x128xbf16>, vector<128x384xbf16>, vector<8x384xf32> -> vector<8x384xf32>
      %10 = vector.broadcast %3 : vector<1x384xf32> to vector<8x384xf32>
      %11 = arith.addf %9, %10 : vector<8x384xf32>
      %12 = arith.index_cast %6 : i32 to index
      %c0_12 = arith.constant 0 : index
      %c0_13 = arith.constant 0 : index
      %13 = vector.load %arg1[%12, %c0_12, %c0_13] : memref<8x8x384xf32, #tpu.memory_space<vmem>>, vector<1x8x384xf32>
      %14 = vector.shape_cast %13 : vector<1x8x384xf32> to vector<8x384xf32>
      %15 = vector.extract_strided_slice %14 {offsets = [0, 0], sizes = [8, 128], strides = [1, 1]} : vector<8x384xf32> to vector<8x128xf32>
      %16 = vector.extract_strided_slice %11 {offsets = [0, 0], sizes = [8, 128], strides = [1, 1]} : vector<8x384xf32> to vector<8x128xf32>
      %17 = arith.addf %15, %16 : vector<8x128xf32>
      %18 = arith.negf %17 : vector<8x128xf32>
      %19 = math.exp %18 : vector<8x128xf32>
      %cst_14 = arith.constant 1.000000e+00 : f32
      %20 = vector.broadcast %cst_14 : f32 to vector<8x128xf32>
      %21 = arith.addf %20, %19 : vector<8x128xf32>
      %22 = arith.divf %20, %21 : vector<8x128xf32>
      %23 = vector.extract_strided_slice %14 {offsets = [0, 128], sizes = [8, 128], strides = [1, 1]} : vector<8x384xf32> to vector<8x128xf32>
      %24 = vector.extract_strided_slice %11 {offsets = [0, 128], sizes = [8, 128], strides = [1, 1]} : vector<8x384xf32> to vector<8x128xf32>
      %25 = arith.addf %23, %24 : vector<8x128xf32>
      %26 = arith.negf %25 : vector<8x128xf32>
      %27 = math.exp %26 : vector<8x128xf32>
      %cst_15 = arith.constant 1.000000e+00 : f32
      %28 = vector.broadcast %cst_15 : f32 to vector<8x128xf32>
      %29 = arith.addf %28, %27 : vector<8x128xf32>
      %30 = arith.divf %28, %29 : vector<8x128xf32>
      %31 = vector.extract_strided_slice %14 {offsets = [0, 256], sizes = [8, 128], strides = [1, 1]} : vector<8x384xf32> to vector<8x128xf32>
      %32 = vector.extract_strided_slice %11 {offsets = [0, 256], sizes = [8, 128], strides = [1, 1]} : vector<8x384xf32> to vector<8x128xf32>
      %33 = arith.mulf %22, %32 : vector<8x128xf32>
      %34 = arith.addf %31, %33 : vector<8x128xf32>
      %35 = math.tanh %34 : vector<8x128xf32>
      %cst_16 = arith.constant 1.000000e+00 : f32
      %36 = vector.broadcast %cst_16 : f32 to vector<8x128xf32>
      %37 = arith.subf %36, %30 : vector<8x128xf32>
      %38 = arith.mulf %37, %35 : vector<8x128xf32>
      %39 = arith.mulf %30, %7 : vector<8x128xf32>
      %40 = arith.addf %38, %39 : vector<8x128xf32>
      %c0_17 = arith.constant 0 : index
      %c0_18 = arith.constant 0 : index
      %41 = vector.load %arg6[%c0_17, %c0_18] : memref<8x128xf32, #tpu.memory_space<vmem>>, vector<8x128xf32>
      tpu.vector_store %arg6[%c0_17, %c0_18], %40 {strides = array<i32>} : memref<8x128xf32, #tpu.memory_space<vmem>>, vector<8x128xf32>,
      %42 = arith.index_cast %6 : i32 to index
      %c0_19 = arith.constant 0 : index
      %c0_20 = arith.constant 0 : index
      %43 = vector.load %arg5[%42, %c0_19, %c0_20] : memref<8x8x128xf32, #tpu.memory_space<vmem>>, vector<1x8x128xf32>
      %44 = vector.shape_cast %43 : vector<1x8x128xf32> to vector<8x128xf32>
      %45 = vector.shape_cast %40 : vector<8x128xf32> to vector<1x8x128xf32>
      tpu.vector_store %arg5[%42, %c0_19, %c0_20], %45 {strides = array<i32>} : memref<8x8x128xf32, #tpu.memory_space<vmem>>, vector<1x8x128xf32>,
    }
    %c8_i32_7 = arith.constant 8 : i32
    return
  }
  func.func @transform_0(%arg0: i32) -> (i32, i32, i32) {
    %c0_i32 = arith.constant 0 : i32
    %c0_i32_0 = arith.constant 0 : i32
    %c0_i32_1 = arith.constant 0 : i32
    return %c0_i32, %arg0, %c0_i32_0 : i32, i32, i32
  }
  func.func @transform_1(%arg0: i32) -> (i32, i32) {
    %c0_i32 = arith.constant 0 : i32
    %c0_i32_0 = arith.constant 0 : i32
    return %arg0, %c0_i32 : i32, i32
  }
  func.func @transform_2(%arg0: i32) -> (i32, i32) {
    %c0_i32 = arith.constant 0 : i32
    %c0_i32_0 = arith.constant 0 : i32
    %c0_i32_1 = arith.constant 0 : i32
    return %c0_i32, %c0_i32_0 : i32, i32
  }
  func.func @transform_3(%arg0: i32) -> (i32, i32) {
    %c0_i32 = arith.constant 0 : i32
    %c0_i32_0 = arith.constant 0 : i32
    %c0_i32_1 = arith.constant 0 : i32
    return %c0_i32, %c0_i32_0 : i32, i32
  }
  func.func @transform_4(%arg0: i32) -> (i32, i32, i32) {
    %c0_i32 = arith.constant 0 : i32
    %c0_i32_0 = arith.constant 0 : i32
    %c0_i32_1 = arith.constant 0 : i32
    return %c0_i32, %arg0, %c0_i32_0 : i32, i32, i32
  }
}

module attributes {stable_mosaic.version = 11 : i64} {
  func.func @_dense_kernel(%arg0: i32, %arg1: i32, %arg2: memref<8x128xbf16, #tpu.memory_space<vmem>>, %arg3: memref<128x384xbf16, #tpu.memory_space<vmem>>, %arg4: memref<1x384xf32, #tpu.memory_space<vmem>>, %arg5: memref<8x384xf32, #tpu.memory_space<vmem>>) attributes {dimension_semantics = [#tpu.dimension_semantics<parallel>, #tpu.dimension_semantics<parallel>], iteration_bounds = array<i64: 1, 1>, scalar_prefetch = 0 : i64, scratch_operands = 0 : i64, tpu.core_type = #tpu.core_type<tc>, window_params = [{transform_indices = @transform_0, window_bounds = array<i64: 8, 128>}, {transform_indices = @transform_1, window_bounds = array<i64: 128, 384>}, {transform_indices = @transform_2, window_bounds = array<i64: 1, 384>}, {transform_indices = @transform_3, window_bounds = array<i64: 8, 384>}]} {
    %c0 = arith.constant 0 : index
    %c0_0 = arith.constant 0 : index
    %0 = vector.load %arg2[%c0, %c0_0] : memref<8x128xbf16, #tpu.memory_space<vmem>>, vector<8x128xbf16>
    %c0_1 = arith.constant 0 : index
    %c0_2 = arith.constant 0 : index
    %1 = vector.load %arg3[%c0_1, %c0_2] : memref<128x384xbf16, #tpu.memory_space<vmem>>, vector<128x384xbf16>
    %cst = arith.constant dense<0.000000e+00> : vector<8x384xf32>
    %2 = tpu.matmul %0, %1, %cst {dimension_numbers = #tpu.dot_dimension_numbers<[1], [0], [0], [1], [0, 0, 1, 1], [], []>} : vector<8x128xbf16>, vector<128x384xbf16>, vector<8x384xf32> -> vector<8x384xf32>
    %c0_3 = arith.constant 0 : index
    %c0_4 = arith.constant 0 : index
    %3 = vector.load %arg4[%c0_3, %c0_4] : memref<1x384xf32, #tpu.memory_space<vmem>>, vector<1x384xf32>
    %4 = vector.broadcast %3 : vector<1x384xf32> to vector<8x384xf32>
    %5 = arith.addf %2, %4 : vector<8x384xf32>
    %c0_5 = arith.constant 0 : index
    %c0_6 = arith.constant 0 : index
    %6 = vector.load %arg5[%c0_5, %c0_6] : memref<8x384xf32, #tpu.memory_space<vmem>>, vector<8x384xf32>
    tpu.vector_store %arg5[%c0_5, %c0_6], %5 {strides = array<i32>} : memref<8x384xf32, #tpu.memory_space<vmem>>, vector<8x384xf32>,
    return
  }
  func.func @transform_0(%arg0: i32, %arg1: i32) -> (i32, i32) {
    %c0_i32 = arith.constant 0 : i32
    %c0_i32_0 = arith.constant 0 : i32
    return %arg0, %c0_i32 : i32, i32
  }
  func.func @transform_1(%arg0: i32, %arg1: i32) -> (i32, i32) {
    %c0_i32 = arith.constant 0 : i32
    %c0_i32_0 = arith.constant 0 : i32
    return %c0_i32, %arg1 : i32, i32
  }
  func.func @transform_2(%arg0: i32, %arg1: i32) -> (i32, i32) {
    %c0_i32 = arith.constant 0 : i32
    %c0_i32_0 = arith.constant 0 : i32
    return %c0_i32, %arg1 : i32, i32
  }
  func.func @transform_3(%arg0: i32, %arg1: i32) -> (i32, i32) {
    %c0_i32 = arith.constant 0 : i32
    return %arg0, %arg1 : i32, i32
  }
}

module attributes {stable_mosaic.version = 11 : i64} {
  func.func @_dense_kernel(%arg0: i32, %arg1: i32, %arg2: memref<64x128xbf16, #tpu.memory_space<vmem>>, %arg3: memref<128x128xbf16, #tpu.memory_space<vmem>>, %arg4: memref<1x128xf32, #tpu.memory_space<vmem>>, %arg5: memref<64x128xf32, #tpu.memory_space<vmem>>) attributes {dimension_semantics = [#tpu.dimension_semantics<parallel>, #tpu.dimension_semantics<parallel>], iteration_bounds = array<i64: 1, 1>, scalar_prefetch = 0 : i64, scratch_operands = 0 : i64, tpu.core_type = #tpu.core_type<tc>, window_params = [{transform_indices = @transform_0, window_bounds = array<i64: 64, 128>}, {transform_indices = @transform_1, window_bounds = array<i64: 128, 128>}, {transform_indices = @transform_2, window_bounds = array<i64: 1, 128>}, {transform_indices = @transform_3, window_bounds = array<i64: 64, 128>}]} {
    %c0 = arith.constant 0 : index
    %c0_0 = arith.constant 0 : index
    %0 = vector.load %arg2[%c0, %c0_0] : memref<64x128xbf16, #tpu.memory_space<vmem>>, vector<64x128xbf16>
    %c0_1 = arith.constant 0 : index
    %c0_2 = arith.constant 0 : index
    %1 = vector.load %arg3[%c0_1, %c0_2] : memref<128x128xbf16, #tpu.memory_space<vmem>>, vector<128x128xbf16>
    %cst = arith.constant dense<0.000000e+00> : vector<64x128xf32>
    %2 = tpu.matmul %0, %1, %cst {dimension_numbers = #tpu.dot_dimension_numbers<[1], [0], [0], [1], [0, 0, 1, 1], [], []>} : vector<64x128xbf16>, vector<128x128xbf16>, vector<64x128xf32> -> vector<64x128xf32>
    %c0_3 = arith.constant 0 : index
    %c0_4 = arith.constant 0 : index
    %3 = vector.load %arg4[%c0_3, %c0_4] : memref<1x128xf32, #tpu.memory_space<vmem>>, vector<1x128xf32>
    %4 = vector.broadcast %3 : vector<1x128xf32> to vector<64x128xf32>
    %5 = arith.addf %2, %4 : vector<64x128xf32>
    %c0_5 = arith.constant 0 : index
    %c0_6 = arith.constant 0 : index
    %6 = vector.load %arg5[%c0_5, %c0_6] : memref<64x128xf32, #tpu.memory_space<vmem>>, vector<64x128xf32>
    tpu.vector_store %arg5[%c0_5, %c0_6], %5 {strides = array<i32>} : memref<64x128xf32, #tpu.memory_space<vmem>>, vector<64x128xf32>,
    return
  }
  func.func @transform_0(%arg0: i32, %arg1: i32) -> (i32, i32) {
    %c0_i32 = arith.constant 0 : i32
    %c0_i32_0 = arith.constant 0 : i32
    return %arg0, %c0_i32 : i32, i32
  }
  func.func @transform_1(%arg0: i32, %arg1: i32) -> (i32, i32) {
    %c0_i32 = arith.constant 0 : i32
    %c0_i32_0 = arith.constant 0 : i32
    return %c0_i32, %arg1 : i32, i32
  }
  func.func @transform_2(%arg0: i32, %arg1: i32) -> (i32, i32) {
    %c0_i32 = arith.constant 0 : i32
    %c0_i32_0 = arith.constant 0 : i32
    return %c0_i32, %arg1 : i32, i32
  }
  func.func @transform_3(%arg0: i32, %arg1: i32) -> (i32, i32) {
    %c0_i32 = arith.constant 0 : i32
    return %arg0, %arg1 : i32, i32
  }
}

</mosaic_0001>

<bundles_post_ra>
// kernel: encoder_decoder_forward.11
= control target key start
LH: loop header
LB: loop body
LE: loop exit
PB: predicated region body
PF: predicated region fallthrough
CT: control target
= control target key end

     0   :  { %s355_s1 = inlined_call_operand.vmem [shape: bf16[128,128], index: 1, kind: input, shape index: {}]   ;;  %s356_s0 = inlined_call_operand.vmem [shape: bf16[64,128], index: 0, kind: input, shape index: {}]   ;;  %s357_s2 = inlined_call_operand.vmem [shape: f32[1,128], index: 2, kind: input, shape index: {}]   ;;  %s358_s3 = inlined_call_operand.vmem [shape: f32[64,128], index: 3, kind: output, shape index: {}]  }
   0x1   :  { %v260_v0 = vld [vmem:[%s355_s1] sm:$0xff]   ;;  %v261_v1 = vld [vmem:[%s355_s1 + $0x8] sm:$0xff]   ;;  %v262_v2 = vld [vmem:[%s355_s1 + $0x10] sm:$0xff]  }
   0x2   :  { %220 = vmatprep.subr.bf16.mxu0 %v260_v0  ;;  %244 = vmatprep.subr.bf16.mxu1 %v260_v0  ;;  %v263_v3 = vld [vmem:[%s355_s1 + $0x18] sm:$0xff]   ;;  %v268_v4 = vld [vmem:[%s356_s0] sm:$0xff]   ;;  %v269_v5 = vld [vmem:[%s356_s0 + $0x10] sm:$0xff]  }
   0x3   :  { %221 = vmatpush3.bf16.msra.mxu0 %v260_v0  ;;  %252 = vmatpush3.bf16.msra.mxu1 %v260_v0  ;;  %v264_v6 = vld [vmem:[%s355_s1 + $0x20] sm:$0xff]   ;;  %v265_v7 = vld [vmem:[%s355_s1 + $0x28] sm:$0xff]   ;;  %v266_v8 = vld [vmem:[%s355_s1 + $0x30] sm:$0xff]  }
   0x4   :  { %222 = vmatprep.subr.bf16.mxu0 %v261_v1  ;;  %245 = vmatprep.subr.bf16.mxu1 %v261_v1  ;;  %v267_v9 = vld [vmem:[%s355_s1 + $0x38] sm:$0xff]   ;;  %v270_v10 = vld [vmem:[%s356_s0 + $0x8] sm:$0xff]   ;;  %v195_v12 = vld [vmem:[%s357_s2] ss:$0 sm:$0xff] }
   0x5   :  { %236 = vmatprep.mubr.bf16.mxu0 %v268_v4  ;;  %240 = vmatprep.mubr.bf16.mxu1 %v269_v5  ;;  %v271_v11 = vld [vmem:[%s356_s0 + $0x18] sm:$0xff]  }
   0x7   :  { %223 = vmatpush3.bf16.msra.mxu0 %v261_v1  ;;  %253 = vmatpush3.bf16.msra.mxu1 %v261_v1 }
   0x8   :  { %224 = vmatprep.subr.bf16.mxu0 %v262_v2  ;;  %246 = vmatprep.subr.bf16.mxu1 %v262_v2 }
   0xb   :  { %225 = vmatpush3.bf16.msra.mxu0 %v262_v2  ;;  %254 = vmatpush3.bf16.msra.mxu1 %v262_v2 }
   0xc   :  { %226 = vmatprep.subr.bf16.mxu0 %v263_v3  ;;  %247 = vmatprep.subr.bf16.mxu1 %v263_v3 }
   0xf   :  { %227 = vmatpush3.bf16.msra.mxu0 %v263_v3  ;;  %255 = vmatpush3.bf16.msra.mxu1 %v263_v3 }
  0x10   :  { %228 = vmatprep.subr.bf16.mxu0 %v264_v6  ;;  %248 = vmatprep.subr.bf16.mxu1 %v264_v6 }
  0x13   :  { %229 = vmatpush3.bf16.msra.mxu0 %v264_v6  ;;  %256 = vmatpush3.bf16.msra.mxu1 %v264_v6 }
  0x14   :  { %230 = vmatprep.subr.bf16.mxu0 %v265_v7  ;;  %249 = vmatprep.subr.bf16.mxu1 %v265_v7 }
  0x17   :  { %231 = vmatpush3.bf16.msra.mxu0 %v265_v7  ;;  %257 = vmatpush3.bf16.msra.mxu1 %v265_v7 }
  0x18   :  { %232 = vmatprep.subr.bf16.mxu0 %v266_v8  ;;  %250 = vmatprep.subr.bf16.mxu1 %v266_v8 }
  0x1b   :  { %233 = vmatpush3.bf16.msra.mxu0 %v266_v8  ;;  %258 = vmatpush3.bf16.msra.mxu1 %v266_v8 }
  0x1c   :  { %234 = vmatprep.subr.bf16.mxu0 %v267_v9  ;;  %251 = vmatprep.subr.bf16.mxu1 %v267_v9 }
  0x1f   :  { %235 = vmatpush3.bf16.msra.mxu0 %v267_v9  ;;  %259 = vmatpush3.bf16.msra.mxu1 %v267_v9 }
  0x22   :  { %237 = vmatmul.mubr.bf16.vlgmr.msra.gmra.mrb[0].mxu0 %v270_v10  ;;  %241 = vmatmul.mubr.bf16.vlgmr.msra.gmra.mrb[0].mxu1 %v271_v11 }
  0xf5   :  { %v238_v13 = vpop.f32.mrb[0].mxu0  ;;  %v242_v14 = vpop.f32.mrb[0].mxu1 }
  0xf6   :  { %v161_v15 = vadd.f32 %v238_v13, %v195_v12  ;;  %v177_v16 = vadd.f32 %v242_v14, %v195_v12  ;;  %v152_v17 = vpop.f32.mrb[1].mxu0  ;;  %v168_v18 = vpop.f32.mrb[1].mxu1 }
  0xf7   :  { %v153_v19 = vadd.f32 %v195_v12, %v152_v17  ;;  %v169_v20 = vadd.f32 %v195_v12, %v168_v18  ;;  %v239_v21 = vpop.f32.mrb[2].mxu0  ;;  %v243_v22 = vpop.f32.mrb[2].mxu1 }
  0xf8   :  { %185 = vst [vmem:[%s358_s3 + $0x10] sm:$0xff] %v161_v15  ;;  %189 = vst [vmem:[%s358_s3 + $0x30] sm:$0xff] %v177_v16  ;;  %v164_v23 = vadd.f32 %v239_v21, %v195_v12  ;;  %v180_v24 = vadd.f32 %v243_v22, %v195_v12  ;;  %v155_v25 = vpop.f32.mrb[3].mxu0  ;;  %v171_v26 = vpop.f32.mrb[3].mxu1 }
  0xf9   :  { %183 = vst [vmem:[%s358_s3] sm:$0xff] %v153_v19  ;;  %187 = vst [vmem:[%s358_s3 + $0x20] sm:$0xff] %v169_v20  ;;  %v156_v27 = vadd.f32 %v195_v12, %v155_v25  ;;  %v172_v28 = vadd.f32 %v195_v12, %v171_v26 }
  0xfa   :  { %186 = vst [vmem:[%s358_s3 + $0x18] sm:$0xff] %v164_v23  ;;  %190 = vst [vmem:[%s358_s3 + $0x38] sm:$0xff] %v180_v24 }
  0xfb   :  { %184 = vst [vmem:[%s358_s3 + $0x8] sm:$0xff] %v156_v27  ;;  %188 = vst [vmem:[%s358_s3 + $0x28] sm:$0xff] %v172_v28 }

// kernel: encoder_decoder_forward.9
= control target key start
LH: loop header
LB: loop body
LE: loop exit
PB: predicated region body
PF: predicated region fallthrough
CT: control target
= control target key end

     0   :  { %v369_v0 = vmov 0.0   ;;  %vm370_vm0 = vmmov 0   ;;  %v371_v3 = vmov 0   ;;  %v50_v27 = vlaneseq  ;;  %s479_s1 = inlined_call_operand.vmem [shape: bf16[128,384], index: 1, kind: input, shape index: {}]   ;;  %s480_s0 = inlined_call_operand.vmem [shape: bf16[8,128], index: 0, kind: input, shape index: {}]   ;;  %s481_s2 = inlined_call_operand.vmem [shape: f32[1,384], index: 2, kind: input, shape index: {}]   ;;  %s482_s3 = inlined_call_operand.vmem [shape: f32[8,384], index: 3, kind: output, shape index: {}]  }
   0x1   :  { %314 = vmatprep.subr.bf16.mxu1 %v369_v0  ;;  %v337_v1 = vld [vmem:[%s479_s1 + $0x4] ss:$12 sps:$4 sm:$0xff]   ;;  %330 = vmatprep.mubr.msk.bf16.mxu1 %vm370_vm0, %v369_v0  ;;  %v339_v2 = vld [vmem:[%s479_s1 + $0x8] ss:$12 sps:$4 sm:$0xff]   ;;  %v340_v4 = vld [vmem:[%s479_s1] ss:$12 sps:$4 sm:$0xff]  }
   0x2   :  { %225 = vmatprep.mubr.bf16.mxu0 %v371_v3  ;;  %193 = vmatprep.subr.bf16.mxu0 %v337_v1  ;;  %v341_v5 = vld [vmem:[%s479_s1 + $0x1c] ss:$12 sps:$4 sm:$0xff]   ;;  %v343_v6 = vld [vmem:[%s479_s1 + $0x20] ss:$12 sps:$4 sm:$0xff]   ;;  %v344_v7 = vld [vmem:[%s479_s1 + $0x18] ss:$12 sps:$4 sm:$0xff]  }
   0x3   :  { %315 = vmatpush3.bf16.msra.mxu1 %v339_v2  ;;  %194 = vmatpush1.bf16.msra.mxu0 %v340_v4  ;;  %v345_v8 = vld [vmem:[%s479_s1 + $0x34] ss:$12 sps:$4 sm:$0xff]   ;;  %v347_v9 = vld [vmem:[%s479_s1 + $0x38] ss:$12 sps:$4 sm:$0xff]   ;;  %v348_v10 = vld [vmem:[%s479_s1 + $0x30] ss:$12 sps:$4 sm:$0xff]  }
   0x4   :  { %316 = vmatprep.subr.bf16.mxu1 %v369_v0  ;;  %195 = vmatprep.subr.bf16.mxu0 %v341_v5  ;;  %v349_v11 = vld [vmem:[%s479_s1 + $0x4c] ss:$12 sps:$4 sm:$0xff]   ;;  %v351_v12 = vld [vmem:[%s479_s1 + $0x50] ss:$12 sps:$4 sm:$0xff]   ;;  %v352_v13 = vld [vmem:[%s479_s1 + $0x48] ss:$12 sps:$4 sm:$0xff]  }
   0x5   :  { %v353_v14 = vld [vmem:[%s479_s1 + $0x64] ss:$12 sps:$4 sm:$0xff]   ;;  %v355_v15 = vld [vmem:[%s479_s1 + $0x68] ss:$12 sps:$4 sm:$0xff]   ;;  %v356_v16 = vld [vmem:[%s479_s1 + $0x60] ss:$12 sps:$4 sm:$0xff]  }
   0x6   :  { %v357_v17 = vld [vmem:[%s479_s1 + $0x7c] ss:$12 sps:$4 sm:$0xff]   ;;  %v359_v18 = vld [vmem:[%s479_s1 + $0x80] ss:$12 sps:$4 sm:$0xff]   ;;  %v360_v19 = vld [vmem:[%s479_s1 + $0x78] ss:$12 sps:$4 sm:$0xff]  }
   0x7   :  { %317 = vmatpush3.bf16.msra.mxu1 %v343_v6  ;;  %196 = vmatpush1.bf16.msra.mxu0 %v344_v7  ;;  %v361_v20 = vld [vmem:[%s479_s1 + $0x94] ss:$12 sps:$4 sm:$0xff]   ;;  %v363_v21 = vld [vmem:[%s479_s1 + $0x98] ss:$12 sps:$4 sm:$0xff]   ;;  %v364_v22 = vld [vmem:[%s479_s1 + $0x90] ss:$12 sps:$4 sm:$0xff]  }
   0x8   :  { %318 = vmatprep.subr.bf16.mxu1 %v369_v0  ;;  %197 = vmatprep.subr.bf16.mxu0 %v345_v8  ;;  %v365_v23 = vld [vmem:[%s479_s1 + $0xac] ss:$12 sps:$4 sm:$0xff]   ;;  %v367_v24 = vld [vmem:[%s479_s1 + $0xb0] ss:$12 sps:$4 sm:$0xff]   ;;  %v368_v25 = vld [vmem:[%s479_s1 + $0xa8] ss:$12 sps:$4 sm:$0xff]  }
   0x9   :  { %v15_v26 = vld [vmem:[%s480_s0] sm:$0xf]  ;;  %v51_v28 = vshrl.u32 %v50_v27, 7 }
   0xa   :  { %v48_v30 = vld [vmem:[%s481_s2] sm:$0x7] }
   0xb   :  { %319 = vmatpush3.bf16.msra.mxu1 %v347_v9  ;;  %198 = vmatpush1.bf16.msra.mxu0 %v348_v10  ;;  %v60_v29 = vsub.s32 2, %v51_v28  ;;  %v52_v31 = vsub.s32 0, %v51_v28  ;;  %v56_v32 = vsub.s32 1, %v51_v28 }
   0xc   :  { %320 = vmatprep.subr.bf16.mxu1 %v369_v0  ;;  %199 = vmatprep.subr.bf16.mxu0 %v349_v11 }
   0xd   :  { %v61_v33 = vrot.slane %v48_v30, %v60_v29  ;;  %v53_v34 = vrot.slane %v48_v30, %v52_v31  ;;  %v57_v35 = vrot.slane %v48_v30, %v56_v32 }
   0xf   :  { %321 = vmatpush3.bf16.msra.mxu1 %v351_v12  ;;  %200 = vmatpush1.bf16.msra.mxu0 %v352_v13 }
  0x10   :  { %322 = vmatprep.subr.bf16.mxu1 %v369_v0  ;;  %201 = vmatprep.subr.bf16.mxu0 %v353_v14 }
  0x13   :  { %323 = vmatpush3.bf16.msra.mxu1 %v355_v15  ;;  %202 = vmatpush1.bf16.msra.mxu0 %v356_v16 }
  0x14   :  { %324 = vmatprep.subr.bf16.mxu1 %v369_v0  ;;  %203 = vmatprep.subr.bf16.mxu0 %v357_v17 }
  0x17   :  { %325 = vmatpush3.bf16.msra.mxu1 %v359_v18  ;;  %204 = vmatpush1.bf16.msra.mxu0 %v360_v19 }
  0x18   :  { %326 = vmatprep.subr.bf16.mxu1 %v369_v0  ;;  %205 = vmatprep.subr.bf16.mxu0 %v361_v20 }
  0x1b   :  { %327 = vmatpush3.bf16.msra.mxu1 %v363_v21  ;;  %206 = vmatpush1.bf16.msra.mxu0 %v364_v22 }
  0x1c   :  { %328 = vmatprep.subr.bf16.mxu1 %v369_v0  ;;  %207 = vmatprep.subr.bf16.mxu0 %v365_v23 }
  0x1f   :  { %329 = vmatpush3.bf16.msra.mxu1 %v367_v24  ;;  %208 = vmatpush1.bf16.msra.mxu0 %v368_v25 }
  0x22   :  { %331 = vmatmul.mubr.bf16.vlgmr.msra.gmra.mrb[0].mxu1 %v15_v26  ;;  %226 = vmatmul.mubr.bf16.vlgmr.msra.gmra.mrb[0].mxu0 %v15_v26 }
  0xf5   :  { %v268_v36 = vpop.f32.mrb[0].mxu1  ;;  %v227_v38 = vpop.f32.mrb[0].mxu0 }
  0xf6   :  { %v269_v37 = vadd.f32 %v268_v36, %v61_v33  ;;  %v332_v39 = vpop.f32.mrb[1].mxu1  ;;  %v228_v40 = vadd.f32 %v227_v38, %v53_v34  ;;  %v229_v41 = vpop.f32.mrb[1].mxu0 }
  0xf7   :  { %v271_v42 = vpop.f32.mrb[2].mxu1  ;;  %v230_v43 = vadd.f32 %v229_v41, %v57_v35  ;;  %v231_v44 = vpop.f32.mrb[2].mxu0 }
  0xf8   :  { %276 = vst [vmem:[%s482_s3 + $0x10] sm:$0xff] %v269_v37  ;;  %v333_v45 = vpop.f32.mrb[3].mxu1  ;;  %274 = vst [vmem:[%s482_s3] sm:$0xff] %v228_v40  ;;  %v232_v46 = vpop.f32.mrb[3].mxu0 }
  0xf9   :  { %275 = vst [vmem:[%s482_s3 + $0x8] sm:$0xff] %v230_v43 }

// kernel: encoder_decoder_forward.7
= control target key start
LH: loop header
LB: loop body
LE: loop exit
PB: predicated region body
PF: predicated region fallthrough
CT: control target
= control target key end

     0   :  { %s613_s28 = smov 0   ;;  %s680_s0 = inlined_call_operand.vmem [shape: f32[8,8,384], index: 0, kind: input, shape index: {}]   ;;  %s681_s1 = inlined_call_operand.vmem [shape: f32[8,128], index: 1, kind: input, shape index: {}]   ;;  %s682_s2 = inlined_call_operand.vmem [shape: bf16[128,384], index: 2, kind: input, shape index: {}]   ;;  %s683_s4 = inlined_call_operand.vmem [shape: f32[8,8,128], index: 4, kind: output, shape index: {}]   ;;  %s684_s3 = inlined_call_operand.vmem [shape: f32[1,384], index: 3, kind: input, shape index: {}]  }
   0x1   :  { %v18_v0 = vld [vmem:[%s681_s1] sm:$0xff]  ;;  %v456_v2 = vld [vmem:[%s682_s2 + $0x8] sm:$0xf]  ;;  %v461_v3 = vld [vmem:[%s682_s2 + $0xc] sm:$0xff] }
   0x2   :  { %v451_v1 = vld [vmem:[%s682_s2] sm:$0xff]  ;;  %19 = vst [vmem:[#allocation2] sm:$0xff] %v18_v0  ;;  %v466_v4 = vld [vmem:[%s682_s2 + $0x14] sm:$0xf]  ;;  %v471_v5 = vld [vmem:[%s682_s2 + $0x18] sm:$0xff] }
   0x3   :  { %v476_v6 = vld [vmem:[%s682_s2 + $0x20] sm:$0xf]  ;;  %v481_v7 = vld [vmem:[%s682_s2 + $0x24] sm:$0xff]  ;;  %v486_v8 = vld [vmem:[%s682_s2 + $0x2c] sm:$0xf] }
   0x4   :  { %v491_v9 = vld [vmem:[%s682_s2 + $0x30] sm:$0xff]  ;;  %v496_v10 = vld [vmem:[%s682_s2 + $0x38] sm:$0xf]  ;;  %v501_v11 = vld [vmem:[%s682_s2 + $0x3c] sm:$0xff] }
   0x5   :  { %v506_v12 = vld [vmem:[%s682_s2 + $0x44] sm:$0xf]  ;;  %v511_v13 = vld [vmem:[%s682_s2 + $0x48] sm:$0xff]  ;;  %v516_v14 = vld [vmem:[%s682_s2 + $0x50] sm:$0xf] }
   0x6   :  { %v521_v15 = vld [vmem:[%s682_s2 + $0x54] sm:$0xff]  ;;  %v526_v16 = vld [vmem:[%s682_s2 + $0x5c] sm:$0xf]  ;;  %v531_v17 = vld [vmem:[%s682_s2 + $0x60] sm:$0xff] }
   0x7   :  { %v536_v18 = vld [vmem:[%s682_s2 + $0x68] sm:$0xf]  ;;  %v541_v19 = vld [vmem:[%s682_s2 + $0x6c] sm:$0xff]  ;;  %v546_v20 = vld [vmem:[%s682_s2 + $0x74] sm:$0xf] }
   0x8   :  { %v551_v21 = vld [vmem:[%s682_s2 + $0x78] sm:$0xff]  ;;  %v556_v22 = vld [vmem:[%s682_s2 + $0x80] sm:$0xf]  ;;  %v561_v23 = vld [vmem:[%s682_s2 + $0x84] sm:$0xff] }
   0x9   :  { %v566_v24 = vld [vmem:[%s682_s2 + $0x8c] sm:$0xf]  ;;  %v571_v25 = vld [vmem:[%s682_s2 + $0x90] sm:$0xff]  ;;  %v576_v26 = vld [vmem:[%s682_s2 + $0x98] sm:$0xf] }
   0xa   :  { %v581_v27 = vld [vmem:[%s682_s2 + $0x9c] sm:$0xff]  ;;  %v586_v28 = vld [vmem:[%s682_s2 + $0xa4] sm:$0xf]  ;;  %v591_v29 = vld [vmem:[%s682_s2 + $0xa8] sm:$0xff] }
   0xb   :  { %v596_v30 = vld [vmem:[%s682_s2 + $0xb0] sm:$0xf]  ;;  %v601_v31 = vld [vmem:[%s682_s2 + $0xb4] sm:$0xff]  ;;  %v606_v32 = vld [vmem:[%s682_s2 + $0xbc] sm:$0xf] }
   0xc   :  { %v611_v33 = vld [vmem:[%s684_s3] sm:$0x7] }
   0xd LB: > { %v331_v34 = vcombine.high %v451_v1, %v461_v3  ;;  %v330_v35 = vcombine.low %v451_v1, %v461_v3  ;;  %v334_v36 = vcombine.high %v471_v5, %v481_v7  ;;  %v333_v37 = vcombine.low %v471_v5, %v481_v7  ;;  %v59_v59 = vld [vmem:[#allocation2] sm:$0xff]  ;;  %s358_s2 = smul.u32 24, %s415_s28  ;;  %s357_s5 = sshll.u32 %s415_s28, 3  ;;  %s415_s28 = sphi %s613_s28, %s58_s28  }
   0xe   : > { %v332_v38 = vcombine.low %v456_v2, %v466_v4  ;;  %v337_v39 = vcombine.high %v491_v9, %v501_v11  ;;  %v417_v40 = vmov 0.0   ;;  %v335_v41 = vcombine.low %v476_v6, %v486_v8  ;;  %s315_s8 = scalar_lea.vmem %s683_s4, %s357_s5  ;;  %s58_s28 = sadd.s32 1, %s415_s28  }
   0xf   : > { %205 = vmatprep.subr.bf16.mxu0 %v331_v34  ;;  %368 = vmatprep.subr.bf16.mxu1 %v417_v40  ;;  %v418_v42 = vmov 0   ;;  %v336_v43 = vcombine.low %v491_v9, %v501_v11  ;;  %vm419_vm0 = vmmov 0   ;;  %v340_v44 = vcombine.high %v511_v13, %v521_v15  ;;  %s288_s30 = scalar_lea.vmem %s680_s0, %s358_s2  ;;  %p55_p0 = scmp.ge.s32.totalorder %s58_s28, 8  }
  0x10   : > { %206 = vmatpush1.bf16.msra.mxu0 %v330_v35  ;;  %369 = vmatpush3.bf16.msra.mxu1 %v332_v38  ;;  %v338_v45 = vcombine.low %v496_v10, %v506_v12  ;;  %v339_v46 = vcombine.low %v511_v13, %v521_v15  ;;  %v343_v47 = vcombine.high %v531_v17, %v541_v19  ;;  %v62_v62 = vlaneseq  ;;  %v289_v38 = vld [vmem:[%s288_s30] sm:$0xff] }
  0x11   : > { %207 = vmatprep.subr.bf16.mxu0 %v334_v36  ;;  %237 = vmatprep.mubr.bf16.mxu0 %v418_v42  ;;  %v341_v48 = vcombine.low %v516_v14, %v526_v16  ;;  %v342_v49 = vcombine.low %v531_v17, %v541_v19  ;;  %v346_v50 = vcombine.high %v551_v21, %v561_v23 }
  0x12   : > { %370 = vmatprep.subr.bf16.mxu1 %v417_v40  ;;  %384 = vmatprep.mubr.msk.bf16.mxu1 %vm419_vm0, %v417_v40  ;;  %v344_v51 = vcombine.low %v536_v18, %v546_v20  ;;  %v345_v52 = vcombine.low %v551_v21, %v561_v23  ;;  %v349_v53 = vcombine.high %v571_v25, %v581_v27  ;;  %v63_v63 = vshrl.u32 %v62_v62, 7  ;;  %v291_v62 = vld [vmem:[%s288_s30 + $0x10] sm:$0xff] }
  0x13   : > { %v347_v54 = vcombine.low %v556_v22, %v566_v24  ;;  %v348_v55 = vcombine.low %v571_v25, %v581_v27  ;;  %v352_v56 = vcombine.high %v591_v29, %v601_v31  ;;  %v350_v57 = vcombine.low %v576_v26, %v586_v28 }
  0x14   : > { %208 = vmatpush1.bf16.msra.mxu0 %v333_v37  ;;  %371 = vmatpush3.bf16.msra.mxu1 %v335_v41  ;;  %v351_v58 = vcombine.low %v591_v29, %v601_v31  ;;  %v353_v60 = vcombine.low %v596_v30, %v606_v32  ;;  %v60_v61 = vpack.c.bf16 %v59_v59, %v59_v59  ;;  %v64_v0 = vsub.s32 0, %v63_v63 }
  0x15   : > { %209 = vmatprep.subr.bf16.mxu0 %v337_v39  ;;  %372 = vmatprep.subr.bf16.mxu1 %v417_v40  ;;  %v68_v34 = vsub.s32 1, %v63_v63 }
  0x16   : > { %v65_v35 = vrot.slane %v611_v33, %v64_v0 }
  0x17   : > { %v69_v36 = vrot.slane %v611_v33, %v68_v34 }
  0x18   : > { %210 = vmatpush1.bf16.msra.mxu0 %v336_v43  ;;  %373 = vmatpush3.bf16.msra.mxu1 %v338_v45  ;;  %v290_v45 = vld [vmem:[%s288_s30 + $0x8] sm:$0xff] }
  0x19   : > { %211 = vmatprep.subr.bf16.mxu0 %v340_v44  ;;  %374 = vmatprep.subr.bf16.mxu1 %v417_v40 }
  0x1c   : > { %212 = vmatpush1.bf16.msra.mxu0 %v339_v46  ;;  %375 = vmatpush3.bf16.msra.mxu1 %v341_v48 }
  0x1d   : > { %213 = vmatprep.subr.bf16.mxu0 %v343_v47  ;;  %376 = vmatprep.subr.bf16.mxu1 %v417_v40 }
  0x20   : > { %214 = vmatpush1.bf16.msra.mxu0 %v342_v49  ;;  %377 = vmatpush3.bf16.msra.mxu1 %v344_v51 }
  0x21   : > { %215 = vmatprep.subr.bf16.mxu0 %v346_v50  ;;  %378 = vmatprep.subr.bf16.mxu1 %v417_v40 }
  0x24   : > { %216 = vmatpush1.bf16.msra.mxu0 %v345_v52  ;;  %379 = vmatpush3.bf16.msra.mxu1 %v347_v54 }
  0x25   : > { %217 = vmatprep.subr.bf16.mxu0 %v349_v53  ;;  %380 = vmatprep.subr.bf16.mxu1 %v417_v40 }
  0x28   : > { %218 = vmatpush1.bf16.msra.mxu0 %v348_v55  ;;  %381 = vmatpush3.bf16.msra.mxu1 %v350_v57  ;;  %v72_v55 = vsub.s32 2, %v63_v63 }
  0x29   : > { %219 = vmatprep.subr.bf16.mxu0 %v352_v56  ;;  %382 = vmatprep.subr.bf16.mxu1 %v417_v40 }
  0x2a   : > { %v73_v56 = vrot.slane %v611_v33, %v72_v55 }
  0x2c   : > { %220 = vmatpush1.bf16.msra.mxu0 %v351_v58  ;;  %383 = vmatpush3.bf16.msra.mxu1 %v353_v60 }
  0x2f   : > { %238 = vmatmul.mubr.bf16.vlgmr.msra.gmra.mrb[0].mxu0 %v60_v61  ;;  %385 = vmatmul.mubr.bf16.vlgmr.msra.gmra.mrb[0].mxu1 %v60_v61 }
 0x102   : > { %v239_v37 = vpop.f32.mrb[0].mxu0  ;;  %v280_v43 = vpop.f32.mrb[0].mxu1 }
 0x103   : > { %v240_v39 = vadd.f32 %v239_v37, %v65_v35  ;;  %v241_v40 = vpop.f32.mrb[1].mxu0  ;;  %v386_v47 = vpop.f32.mrb[1].mxu1  ;;  %v281_v60 = vadd.f32 %v280_v43, %v73_v56 }
 0x104   : > { %v242_v41 = vadd.f32 %v241_v40, %v69_v36  ;;  %v243_v42 = vpop.f32.mrb[2].mxu0  ;;  %v283_v48 = vpop.f32.mrb[2].mxu1 }
 0x105   : > { %v292_v44 = vadd.f32 %v289_v38, %v240_v39  ;;  %v244_v46 = vpop.f32.mrb[3].mxu0  ;;  %v387_v50 = vpop.f32.mrb[3].mxu1 }
 0x106   : > { %v299_v51 = vadd.f32 %v290_v45, %v242_v41 }
 0x107   : > { %v355_v49 = vmul.f32 -1.442695, %v292_v44 }
 0x108   : > { %v356_v52 = vmul.f32 -1.442695, %v299_v51 }
 0x109   : > { %399 = vpow2.f32 %v355_v49 }
 0x10a   : > { %401 = vpow2.f32 %v356_v52 }
 0x113   : > { %v400_v53 = vpop.eup %399 }
 0x114   : > { %v296_v54 = vadd.f32 1.0, %v400_v53  ;;  %v402_v57 = vpop.eup %401 }
 0x115   : > { %v303_v58 = vadd.f32 1.0, %v402_v57 }
 0x116   : > { %403 = vrcp.f32 %v296_v54 }
 0x117   : > { %405 = vrcp.f32 %v303_v58 }
 0x120   : > { %v404_v61 = vpop.eup %403 }
 0x121   : > { %v306_v0 = vmul.f32 %v404_v61, %v281_v60  ;;  %v406_v35 = vpop.eup %405 }
 0x122   : > { %v309_v36 = vsub.f32 1.0, %v406_v35  ;;  %v311_v38 = vmul.f32 %v406_v35, %v59_v59 }
 0x123   : > { %v307_v34 = vadd.f32 %v306_v0, %v291_v62 }
 0x125   : > { %407 = vtanh.f32 %v307_v34 }
 0x12e   :  { %57 = sbr.rel (!%p55_p0) target bundleno = 13 (0xd), region = 45 }
 0x12f   : > { %v408_v37 = vpop.eup %407 }
 0x130   : > { %v310_v39 = vmul.f32 %v408_v37, %v309_v36 }
 0x132   : > { %v312_v63 = vadd.f32 %v311_v38, %v310_v39 }
 0x134   : > { %313 = vst [vmem:[#allocation2] sm:$0xff] %v312_v63  ;;  %316 = vst [vmem:[%s315_s8] sm:$0xff] %v312_v63 }

// kernel: encoder_decoder_forward.8
= control target key start
LH: loop header
LB: loop body
LE: loop exit
PB: predicated region body
PF: predicated region fallthrough
CT: control target
= control target key end

     0   :  { %v491_v1 = vmov 0   ;;  %v57_v29 = vlaneseq  ;;  %s695_s1 = inlined_call_operand.vmem [shape: bf16[128,384], index: 1, kind: input, shape index: {}]   ;;  %s696_s0 = inlined_call_operand.vmem [shape: bf16[64,128], index: 0, kind: input, shape index: {}]   ;;  %s697_s2 = inlined_call_operand.vmem [shape: f32[1,384], index: 2, kind: input, shape index: {}]   ;;  %s698_s3 = inlined_call_operand.vmem [shape: f32[64,384], index: 3, kind: output, shape index: {}]  }
   0x1   :  { %v455_v0 = vld [vmem:[%s695_s1 + $0x4] ss:$12 sps:$4 sm:$0xff]   ;;  %256 = vmatprep.mubr.bf16.mxu0 %v491_v1  ;;  %v457_v2 = vld [vmem:[%s695_s1] ss:$12 sps:$4 sm:$0xff]   ;;  %v458_v3 = vld [vmem:[%s695_s1 + $0x1c] ss:$12 sps:$4 sm:$0xff]  }
   0x2   :  { %224 = vmatprep.subr.bf16.mxu0 %v455_v0  ;;  %v460_v4 = vld [vmem:[%s695_s1 + $0x18] ss:$12 sps:$4 sm:$0xff]   ;;  %v461_v5 = vld [vmem:[%s695_s1 + $0x34] ss:$12 sps:$4 sm:$0xff]   ;;  %v463_v7 = vld [vmem:[%s695_s1 + $0x30] ss:$12 sps:$4 sm:$0xff]  }
   0x3   :  { %225 = vmatpush1.bf16.msra.mxu0 %v457_v2  ;;  %v467_v6 = vld [vmem:[%s695_s1 + $0x8] ss:$12 sps:$4 sm:$0xff]   ;;  %v464_v8 = vld [vmem:[%s695_s1 + $0x4c] ss:$12 sps:$4 sm:$0xff]   ;;  %v468_v12 = vld [vmem:[%s695_s1 + $0x64] ss:$12 sps:$4 sm:$0xff]  }
   0x4   :  { %226 = vmatprep.subr.bf16.mxu0 %v458_v3  ;;  %430 = vmatprep.subr.bf16.mxu1 %v467_v6  ;;  %v471_v9 = vld [vmem:[%s695_s1 + $0x20] ss:$12 sps:$4 sm:$0xff]   ;;  %v475_v10 = vld [vmem:[%s695_s1 + $0x38] ss:$12 sps:$4 sm:$0xff]   ;;  %v466_v11 = vld [vmem:[%s695_s1 + $0x48] ss:$12 sps:$4 sm:$0xff]  }
   0x5   :  { %431 = vmatpush3.bf16.msra.mxu1 %v467_v6  ;;  %v470_v13 = vld [vmem:[%s695_s1 + $0x60] ss:$12 sps:$4 sm:$0xff]   ;;  %v479_v14 = vld [vmem:[%s695_s1 + $0x50] ss:$12 sps:$4 sm:$0xff]   ;;  %v483_v17 = vld [vmem:[%s695_s1 + $0x68] ss:$12 sps:$4 sm:$0xff]  }
   0x6   :  { %432 = vmatprep.subr.bf16.mxu1 %v471_v9  ;;  %v472_v15 = vld [vmem:[%s695_s1 + $0x7c] ss:$12 sps:$4 sm:$0xff]   ;;  %v484_v16 = vld [vmem:[%s696_s0] sm:$0xff]   ;;  %v480_v22 = vld [vmem:[%s695_s1 + $0xac] ss:$12 sps:$4 sm:$0xff]   ;;  %v58_v30 = vshrl.u32 %v57_v29, 7 }
   0x7   :  { %227 = vmatpush1.bf16.msra.mxu0 %v460_v4  ;;  %446 = vmatprep.mubr.bf16.mxu1 %v484_v16  ;;  %v474_v18 = vld [vmem:[%s695_s1 + $0x78] ss:$12 sps:$4 sm:$0xff]   ;;  %v476_v19 = vld [vmem:[%s695_s1 + $0x94] ss:$12 sps:$4 sm:$0xff]   ;;  %v478_v21 = vld [vmem:[%s695_s1 + $0x90] ss:$12 sps:$4 sm:$0xff]  }
   0x8   :  { %228 = vmatprep.subr.bf16.mxu0 %v461_v5  ;;  %v485_v20 = vld [vmem:[%s695_s1 + $0x80] ss:$12 sps:$4 sm:$0xff]   ;;  %v486_v23 = vld [vmem:[%s695_s1 + $0x98] ss:$12 sps:$4 sm:$0xff]   ;;  %v482_v24 = vld [vmem:[%s695_s1 + $0xa8] ss:$12 sps:$4 sm:$0xff]  }
   0x9   :  { %433 = vmatpush3.bf16.msra.mxu1 %v471_v9  ;;  %v488_v25 = vld [vmem:[%s695_s1 + $0xb0] ss:$12 sps:$4 sm:$0xff]   ;;  %v487_v26 = vld [vmem:[%s696_s0 + $0x8] sm:$0xff]   ;;  %v59_v31 = vsub.s32 0, %v58_v30  ;;  %v55_v32 = vld [vmem:[%s697_s2] sm:$0x7] }
   0xa   :  { %434 = vmatprep.subr.bf16.mxu1 %v475_v10  ;;  %v489_v27 = vld [vmem:[%s696_s0 + $0x10] sm:$0xff]   ;;  %v490_v28 = vld [vmem:[%s696_s0 + $0x18] sm:$0xff]   ;;  %v63_v33 = vsub.s32 1, %v58_v30  ;;  %v67_v36 = vsub.s32 2, %v58_v30 }
   0xb   :  { %229 = vmatpush1.bf16.msra.mxu0 %v463_v7  ;;  %v603_v34 = vrot.slane %v55_v32, %v59_v31 }
   0xc   :  { %230 = vmatprep.subr.bf16.mxu0 %v464_v8  ;;  %v605_v35 = vrot.slane %v55_v32, %v63_v33  ;;  %v68_v44 = vrot.slane %v55_v32, %v67_v36 }
   0xd   :  { %435 = vmatpush3.bf16.msra.mxu1 %v475_v10 }
   0xe   :  { %436 = vmatprep.subr.bf16.mxu1 %v479_v14 }
   0xf   :  { %231 = vmatpush1.bf16.msra.mxu0 %v466_v11 }
  0x10   :  { %232 = vmatprep.subr.bf16.mxu0 %v468_v12 }
  0x11   :  { %437 = vmatpush3.bf16.msra.mxu1 %v479_v14 }
  0x12   :  { %438 = vmatprep.subr.bf16.mxu1 %v483_v17 }
  0x13   :  { %233 = vmatpush1.bf16.msra.mxu0 %v470_v13 }
  0x14   :  { %234 = vmatprep.subr.bf16.mxu0 %v472_v15 }
  0x15   :  { %439 = vmatpush3.bf16.msra.mxu1 %v483_v17 }
  0x16   :  { %440 = vmatprep.subr.bf16.mxu1 %v485_v20 }
  0x17   :  { %235 = vmatpush1.bf16.msra.mxu0 %v474_v18 }
  0x18   :  { %236 = vmatprep.subr.bf16.mxu0 %v476_v19 }
  0x19   :  { %441 = vmatpush3.bf16.msra.mxu1 %v485_v20 }
  0x1a   :  { %442 = vmatprep.subr.bf16.mxu1 %v486_v23 }
  0x1b   :  { %237 = vmatpush1.bf16.msra.mxu0 %v478_v21 }
  0x1c   :  { %238 = vmatprep.subr.bf16.mxu0 %v480_v22 }
  0x1d   :  { %443 = vmatpush3.bf16.msra.mxu1 %v486_v23 }
  0x1e   :  { %444 = vmatprep.subr.bf16.mxu1 %v488_v25 }
  0x1f   :  { %239 = vmatpush1.bf16.msra.mxu0 %v482_v24 }
  0x21   :  { %445 = vmatpush3.bf16.msra.mxu1 %v488_v25 }
  0x22   :  { %257 = vmatmul.mubr.bf16.vlgmr.msra.gmra.mrb[0].mxu0 %v484_v16 }
  0x23   :  { %266 = vmatprep.mubr.bf16.mxu0 %v491_v1 }
  0x24   :  { %447 = vmatmul.mubr.bf16.vlgmr.msra.gmra.mrb[0].mxu1 %v487_v26 }
  0x25   :  { %450 = vmatprep.mubr.bf16.mxu1 %v489_v27 }
  0x2a   :  { %267 = vmatmul.mubr.bf16.gmra.mrb[4].mxu0 %v487_v26 }
  0x2b   :  { %276 = vmatprep.mubr.bf16.mxu0 %v491_v1 }
  0x2c   :  { %451 = vmatmul.mubr.bf16.gmra.mrb[4].mxu1 %v490_v28 }
  0x32   :  { %277 = vmatmul.mubr.bf16.gmra.mrb[8].mxu0 %v489_v27 }
  0x33   :  { %286 = vmatprep.mubr.bf16.mxu0 %v491_v1 }
  0x3a   :  { %287 = vmatmul.mubr.bf16.gmra.mrb[12].mxu0 %v490_v28 }
  0xf5   :  { %v258_v37 = vpop.f32.mrb[0].mxu0 }
  0xf6   :  { %v259_v38 = vadd.f32 %v258_v37, %v603_v34  ;;  %v260_v39 = vpop.f32.mrb[1].mxu0 }
  0xf7   :  { %v261_v40 = vadd.f32 %v260_v39, %v605_v35  ;;  %v262_v41 = vpop.f32.mrb[2].mxu0  ;;  %v448_v46 = vpop.f32.mrb[0].mxu1 }
  0xf8   :  { %362 = vst [vmem:[%s698_s3] sm:$0xff] %v259_v38  ;;  %v263_v42 = vadd.f32 %v262_v41, %v603_v34  ;;  %v264_v43 = vpop.f32.mrb[3].mxu0  ;;  %v340_v47 = vadd.f32 %v448_v46, %v68_v44  ;;  %v331_v48 = vpop.f32.mrb[1].mxu1 }
  0xf9   :  { %363 = vst [vmem:[%s698_s3 + $0x8] sm:$0xff] %v261_v40  ;;  %v265_v45 = vadd.f32 %v264_v43, %v605_v35  ;;  %v332_v50 = vadd.f32 %v331_v48, %v68_v44  ;;  %v449_v51 = vpop.f32.mrb[2].mxu1 }
  0xfa   :  { %365 = vst [vmem:[%s698_s3 + $0x18] sm:$0xff] %v263_v42  ;;  %370 = vst [vmem:[%s698_s3 + $0x40] sm:$0xff] %v340_v47  ;;  %v343_v54 = vadd.f32 %v449_v51, %v68_v44  ;;  %v334_v55 = vpop.f32.mrb[3].mxu1 }
  0xfb   :  { %366 = vst [vmem:[%s698_s3 + $0x20] sm:$0xff] %v265_v45  ;;  %364 = vst [vmem:[%s698_s3 + $0x10] sm:$0xff] %v332_v50  ;;  %v335_v58 = vadd.f32 %v334_v55, %v68_v44 }
  0xfc   :  { %373 = vst [vmem:[%s698_s3 + $0x58] sm:$0xff] %v343_v54 }
  0xfd   :  { %v268_v49 = vpop.f32.mrb[4].mxu0  ;;  %367 = vst [vmem:[%s698_s3 + $0x28] sm:$0xff] %v335_v58 }
  0xfe   :  { %v269_v52 = vadd.f32 %v268_v49, %v603_v34  ;;  %v270_v53 = vpop.f32.mrb[5].mxu0 }
  0xff   :  { %v271_v56 = vadd.f32 %v270_v53, %v605_v35  ;;  %v272_v57 = vpop.f32.mrb[6].mxu0  ;;  %v452_v62 = vpop.f32.mrb[4].mxu1 }
 0x100   :  { %368 = vst [vmem:[%s698_s3 + $0x30] sm:$0xff] %v269_v52  ;;  %v273_v59 = vadd.f32 %v272_v57, %v603_v34  ;;  %v274_v60 = vpop.f32.mrb[7].mxu0  ;;  %v356_v63 = vadd.f32 %v452_v62, %v68_v44  ;;  %v347_v0 = vpop.f32.mrb[5].mxu1 }
 0x101   :  { %369 = vst [vmem:[%s698_s3 + $0x38] sm:$0xff] %v271_v56  ;;  %v275_v61 = vadd.f32 %v274_v60, %v605_v35  ;;  %v348_v2 = vadd.f32 %v347_v0, %v68_v44  ;;  %v453_v3 = vpop.f32.mrb[6].mxu1 }
 0x102   :  { %371 = vst [vmem:[%s698_s3 + $0x48] sm:$0xff] %v273_v59  ;;  %382 = vst [vmem:[%s698_s3 + $0xa0] sm:$0xff] %v356_v63  ;;  %v359_v6 = vadd.f32 %v453_v3, %v68_v44  ;;  %v350_v7 = vpop.f32.mrb[7].mxu1 }
 0x103   :  { %372 = vst [vmem:[%s698_s3 + $0x50] sm:$0xff] %v275_v61  ;;  %376 = vst [vmem:[%s698_s3 + $0x70] sm:$0xff] %v348_v2  ;;  %v351_v10 = vadd.f32 %v350_v7, %v68_v44 }
 0x104   :  { %385 = vst [vmem:[%s698_s3 + $0xb8] sm:$0xff] %v359_v6 }
 0x105   :  { %v278_v1 = vpop.f32.mrb[8].mxu0  ;;  %379 = vst [vmem:[%s698_s3 + $0x88] sm:$0xff] %v351_v10 }
 0x106   :  { %v279_v4 = vadd.f32 %v278_v1, %v603_v34  ;;  %v280_v5 = vpop.f32.mrb[9].mxu0 }
 0x107   :  { %v281_v8 = vadd.f32 %v280_v5, %v605_v35  ;;  %v282_v9 = vpop.f32.mrb[10].mxu0 }
 0x108   :  { %374 = vst [vmem:[%s698_s3 + $0x60] sm:$0xff] %v279_v4  ;;  %v283_v11 = vadd.f32 %v282_v9, %v603_v34  ;;  %v284_v12 = vpop.f32.mrb[11].mxu0 }
 0x109   :  { %375 = vst [vmem:[%s698_s3 + $0x68] sm:$0xff] %v281_v8  ;;  %v285_v13 = vadd.f32 %v284_v12, %v605_v35 }
 0x10a   :  { %377 = vst [vmem:[%s698_s3 + $0x78] sm:$0xff] %v283_v11 }
 0x10b   :  { %378 = vst [vmem:[%s698_s3 + $0x80] sm:$0xff] %v285_v13 }
 0x10d   :  { %v288_v14 = vpop.f32.mrb[12].mxu0 }
 0x10e   :  { %v289_v15 = vadd.f32 %v288_v14, %v603_v34  ;;  %v290_v16 = vpop.f32.mrb[13].mxu0 }
 0x10f   :  { %v291_v17 = vadd.f32 %v290_v16, %v605_v35  ;;  %v292_v18 = vpop.f32.mrb[14].mxu0 }
 0x110   :  { %380 = vst [vmem:[%s698_s3 + $0x90] sm:$0xff] %v289_v15  ;;  %v293_v19 = vadd.f32 %v292_v18, %v603_v34  ;;  %v294_v20 = vpop.f32.mrb[15].mxu0 }
 0x111   :  { %381 = vst [vmem:[%s698_s3 + $0x98] sm:$0xff] %v291_v17  ;;  %v295_v21 = vadd.f32 %v294_v20, %v605_v35 }
 0x112   :  { %383 = vst [vmem:[%s698_s3 + $0xa8] sm:$0xff] %v293_v19 }
 0x113   :  { %384 = vst [vmem:[%s698_s3 + $0xb0] sm:$0xff] %v295_v21 }

</bundles_post_ra>
